<compile_context>
chip_gen: v5e
topology: v5e:2x2
jax: 0.10.0
libtpu: 0.0.40
codegen_flags: <defaults>
</compile_context>

<pallas_src>
import functools
import math

import jax
import jax.numpy as jnp
from jax.experimental import pallas as pl
from jax.experimental.pallas import tpu as pltpu


def _mixprop_kernel(x_ref, a_ref, wproj_ref, bias_ref, o_ref, slab_ref,
                    *, gdep, alpha, c_in, n_nodes, use_kron_a):
    """One (batch, time-tile) step of fused MixProp.

    x_ref:     (c_in*N, tT)  bf16   input features, row index = c*N + n
    a_ref:     (c_in*N, c_in*N) bf16 kron(I_c, A') if use_kron_a else (N, N) A'
    wproj_ref: (c_out*N, (gdep+1)*c_in*N) bf16 kron(W, I_N)
    bias_ref:  (c_out*N, 1)  f32
    o_ref:     (c_out*N, tT) f32    output, row index = o*N + n
    slab_ref:  ((gdep+1)*c_in*N, tT) bf16 VMEM scratch holding all hops
    """
    cn = c_in * n_nodes

    x_b = x_ref[...]                       # bf16
    x_f = x_b.astype(jnp.float32)          # f32 copy for the alpha-mix (VPU)

    # hop 0 contribution (the un-propagated X)
    slab_ref[0:cn, :] = x_b

    h_b = x_b
    for g in range(1, gdep + 1):
        if use_kron_a:
            prop = jnp.dot(a_ref[...], h_b,
                           preferred_element_type=jnp.float32)
        else:
            a_small = a_ref[...]
            parts = []
            for c in range(c_in):
                parts.append(jnp.dot(
                    a_small, h_b[c * n_nodes:(c + 1) * n_nodes, :],
                    preferred_element_type=jnp.float32))
            prop = jnp.concatenate(parts, axis=0)
        # alpha-mix kept in f32 on the VPU (v5e has no bf16 VPU).
        h_f = alpha * x_f + (1.0 - alpha) * prop
        h_b = h_f.astype(jnp.bfloat16)
        slab_ref[g * cn:(g + 1) * cn, :] = h_b

    # Single big-K projection: (ON, (gdep+1)*CN) @ ((gdep+1)*CN, tT)
    acc = jnp.dot(wproj_ref[...], slab_ref[...],
                  preferred_element_type=jnp.float32)
    o_ref[...] = (acc + bias_ref[...]).astype(o_ref.dtype)


def _pick_time_tile(T, target, min_time_steps=1):
    """Largest lane-dense (multiple-of-128) divisor of T <= target, preferring
    tiles that still leave >= min_time_steps grid steps along time."""
    cands = [d for d in range(128, min(T, target) + 1, 128) if T % d == 0]
    if T <= target:
        cands.append(T)
    if not cands:
        # Awkward T with no 128-multiple divisor: any divisor <= target.
        cands = [d for d in range(1, min(T, target) + 1) if T % d == 0]
    ok = [d for d in cands if T // d >= min_time_steps]
    return max(ok) if ok else max(cands)


def mixprop_forward(x, adj, weight, bias, *, gdep, alpha,
                    t_tile=2048, kron_a_max_dim=128):
    """Fused MixProp forward.

    x:      (B, c_in, N, T) float32
    adj:    (N, N) adjacency matrix
    weight: (c_out, (gdep+1)*c_in) 1x1-conv weight
    bias:   (c_out,)
    returns (B, c_out, N, T) float32
    """
    B, c_in, N, T = x.shape
    c_out = weight.shape[0]
    assert weight.shape[1] == (gdep + 1) * c_in

    CN = c_in * N
    ON = c_out * N
    KN = (gdep + 1) * CN

    # --- tiny adjacency & parameter preprocessing (wrapper-side) ---
    a = adj.astype(jnp.float32) + jnp.eye(N, dtype=jnp.float32)
    a_norm = a / jnp.sum(a, axis=1, keepdims=True)

    use_kron_a = CN <= kron_a_max_dim
    if use_kron_a:
        a_op = jnp.kron(jnp.eye(c_in, dtype=jnp.float32),
                        a_norm).astype(jnp.bfloat16)                      # (CN, CN)
    else:
        a_op = a_norm.astype(jnp.bfloat16)                                # (N, N)

    eye_n = jnp.eye(N, dtype=jnp.float32)
    # Fused projection operator: slab row index (g*c_in + c)*N + n matches the
    # channel-concat order of the PyTorch 1x1 conv -> kron(W, I_N).
    wproj = jnp.kron(weight.astype(jnp.float32), eye_n).astype(jnp.bfloat16)  # (ON, KN)
    bias_big = jnp.repeat(bias.astype(jnp.float32), N).reshape(ON, 1)          # (ON, 1)

    # Free reshape (keeps NCHW memory order): time is the lane axis.
    # bf16 halves the kernel's HBM read of X (it is memory/overhead bound).
    x3 = x.reshape(B, CN, T).astype(jnp.bfloat16)

    # Keep a few grid steps around for DMA pipelining / megacore sharding.
    min_time_steps = max(1, -(-4 // B))   # ceil(4 / B)
    tT = _pick_time_tile(T, t_tile, min_time_steps)
    n_t = T // tT
    grid = (B, n_t)

    kernel = functools.partial(_mixprop_kernel, gdep=gdep, alpha=float(alpha),
                               c_in=c_in, n_nodes=N, use_kron_a=use_kron_a)

    # Explicit VMEM budget (constants single-buffered, x/out double-buffered).
    vmem_bytes = (2 * CN * tT * 2            # x blocks (bf16, double buffered)
                  + 2 * ON * tT * 4          # out blocks (f32, double buffered)
                  + KN * tT * 2              # hop slab scratch (bf16)
                  + a_op.size * 2            # A operator (resident, bf16)
                  + wproj.size * 2           # projection operator (resident, bf16)
                  + ON * 128 * 4)            # bias (lane-padded)
    vmem_limit = int(min(max(int(1.5 * vmem_bytes) + (2 << 20), 32 << 20),
                         64 << 20))

    if use_kron_a:
        hop_flops = gdep * 2 * CN * CN * T
    else:
        hop_flops = gdep * c_in * 2 * N * N * T
    flops = B * (hop_flops + 2 * ON * KN * T)
    bytes_accessed = (B * CN * T * 2 + B * ON * T * 4
                      + a_op.size * 2 + wproj.size * 2 + ON * 4)

    # Grid-constant operands: whole array staged once into VMEM (no per-step
    # DMA, no double buffer).
    const_vmem = pl.BlockSpec(memory_space=pltpu.MemorySpace.VMEM)

    out3 = pl.pallas_call(
        kernel,
        out_shape=jax.ShapeDtypeStruct((B, ON, T), jnp.float32),
        grid_spec=pltpu.PrefetchScalarGridSpec(
            num_scalar_prefetch=0,
            grid=grid,
            in_specs=[
                pl.BlockSpec((None, CN, tT), lambda b, j: (b, 0, j)),   # x
                const_vmem,                                             # A operator
                const_vmem,                                             # kron(W, I_N)
                const_vmem,                                             # bias
            ],
            out_specs=pl.BlockSpec((None, ON, tT), lambda b, j: (b, 0, j)),
            scratch_shapes=[pltpu.VMEM((KN, tT), jnp.bfloat16)],
        ),
        compiler_params=pltpu.CompilerParams(
            dimension_semantics=("parallel", "parallel"),
            vmem_limit_bytes=vmem_limit),
        cost_estimate=pl.CostEstimate(
            flops=int(flops), transcendentals=0,
            bytes_accessed=int(bytes_accessed)),
    )(x3, a_op, wproj, bias_big)

    # Free reshape back to NCHW: row index o*N + n -> (o, n).
    return out3.reshape(B, c_out, N, T)


def init_params(key, c_in, c_out, gdep):
    """Matches MixProp._reset_parameters on the inner Conv2d:
       weight (c_out, (gdep+1)*c_in, 1, 1): xavier_uniform_
       bias (c_out,): uniform_ in [0, 1)
    """
    k_total = (gdep + 1) * c_in
    k_w, k_b = jax.random.split(key)
    bound = math.sqrt(6.0 / (k_total + c_out))   # 1x1 kernel: fan_in=k_total, fan_out=c_out
    weight = jax.random.uniform(k_w, (c_out, k_total), jnp.float32,
                                minval=-bound, maxval=bound)
    bias = jax.random.uniform(k_b, (c_out,), jnp.float32, minval=0.0, maxval=1.0)
    return weight, bias


def mixprop_reference(x, adj, weight, bias, gdep, alpha):
    """Pure-jnp (f32) reference matching the PyTorch MixProp.forward."""
    N = adj.shape[0]
    a = adj + jnp.eye(N, dtype=adj.dtype)
    a = a / jnp.sum(a, axis=1, keepdims=True)
    h = x
    h0 = x
    for _ in range(gdep):
        h = alpha * x + (1.0 - alpha) * jnp.einsum('bcwt,vw->bcvt', h, a)
        h0 = jnp.concatenate([h0, h], axis=1)
    return jnp.einsum('ok,bknt->bont', weight, h0) + bias[None, :, None, None]


if __name__ == "__main__":
    key = jax.random.PRNGKey(0)
    k_x, k_a, k_p = jax.random.split(key, 3)

    B, c_in, c_out, num_nodes, seq_len = 2, 4, 8, 16, 512
    gdep, alpha = 2, 0.05

    x = jax.random.normal(k_x, (B, c_in, num_nodes, seq_len), jnp.float32)
    adj = jax.random.uniform(k_a, (num_nodes, num_nodes), jnp.float32)
    weight, bias = init_params(k_p, c_in, c_out, gdep)

    y = mixprop_forward(x, adj, weight, bias, gdep=gdep, alpha=alpha)
    y = jax.block_until_ready(y)

    y_ref = mixprop_reference(x, adj, weight, bias, gdep, alpha)
    assert y.shape == (B, c_out, num_nodes, seq_len)
    max_err = jnp.max(jnp.abs(y - y_ref))
    # bf16 MXU operands (f32 accumulate / f32 mix) -> relaxed tolerance.
    assert max_err < 3e-2, f"max abs err = {max_err}"

    print("KERNEL_OK")
</pallas_src>

<mosaic_0001>
module attributes {stable_mosaic.version = 11 : i64} {
  func.func @_mixprop_kernel(%arg0: i32, %arg1: i32, %arg2: memref<1x64x256xbf16, #tpu.memory_space<vmem>>, %arg3: memref<64x64xbf16, #tpu.memory_space<vmem>>, %arg4: memref<128x192xbf16, #tpu.memory_space<vmem>>, %arg5: memref<128x1xf32, #tpu.memory_space<vmem>>, %arg6: memref<1x128x256xf32, #tpu.memory_space<vmem>>, %arg7: memref<192x256xbf16, #tpu.memory_space<vmem>>) attributes {dimension_semantics = [#tpu.dimension_semantics<parallel>, #tpu.dimension_semantics<parallel>], iteration_bounds = array<i64: 2, 2>, scalar_prefetch = 0 : i64, scratch_operands = 1 : i64, tpu.core_type = #tpu.core_type<tc>, window_params = [{transform_indices = @transform_0, window_bounds = array<i64: 1, 64, 256>}, {pipeline_mode = #tpu.pipeline_mode<synchronous>, transform_indices = @transform_1, window_bounds = array<i64: 64, 64>}, {pipeline_mode = #tpu.pipeline_mode<synchronous>, transform_indices = @transform_2, window_bounds = array<i64: 128, 192>}, {pipeline_mode = #tpu.pipeline_mode<synchronous>, transform_indices = @transform_3, window_bounds = array<i64: 128, 1>}, {transform_indices = @transform_4, window_bounds = array<i64: 1, 128, 256>}]} {
    %c0 = arith.constant 0 : index
    %c0_0 = arith.constant 0 : index
    %c0_1 = arith.constant 0 : index
    %0 = vector.load %arg2[%c0, %c0_0, %c0_1] : memref<1x64x256xbf16, #tpu.memory_space<vmem>>, vector<1x64x256xbf16>
    %1 = vector.shape_cast %0 : vector<1x64x256xbf16> to vector<64x256xbf16>
    %2 = arith.extf %1 : vector<64x256xbf16> to vector<64x256xf32>
    %c0_2 = arith.constant 0 : index
    %c0_3 = arith.constant 0 : index
    %3 = vector.load %arg7[%c0_2, %c0_3] : memref<192x256xbf16, #tpu.memory_space<vmem>>, vector<64x256xbf16>
    tpu.vector_store %arg7[%c0_2, %c0_3], %1 {strides = array<i32>} : memref<192x256xbf16, #tpu.memory_space<vmem>>, vector<64x256xbf16>,
    %c0_4 = arith.constant 0 : index
    %c0_5 = arith.constant 0 : index
    %4 = vector.load %arg3[%c0_4, %c0_5] : memref<64x64xbf16, #tpu.memory_space<vmem>>, vector<64x64xbf16>
    %cst = arith.constant dense<0.000000e+00> : vector<64x256xf32>
    %5 = tpu.matmul %4, %1, %cst {dimension_numbers = #tpu.dot_dimension_numbers<[1], [0], [0], [1], [0, 0, 1, 1], [], []>} : vector<64x64xbf16>, vector<64x256xbf16>, vector<64x256xf32> -> vector<64x256xf32>
    %cst_6 = arith.constant 5.000000e-02 : f32
    %6 = vector.broadcast %cst_6 : f32 to vector<64x256xf32>
    %7 = arith.mulf %6, %2 : vector<64x256xf32>
    %cst_7 = arith.constant 0.949999988 : f32
    %8 = vector.broadcast %cst_7 : f32 to vector<64x256xf32>
    %9 = arith.mulf %8, %5 : vector<64x256xf32>
    %10 = arith.addf %7, %9 : vector<64x256xf32>
    %11 = arith.truncf %10 : vector<64x256xf32> to vector<64x256xbf16>
    %c64 = arith.constant 64 : index
    %c0_8 = arith.constant 0 : index
    %12 = vector.load %arg7[%c64, %c0_8] : memref<192x256xbf16, #tpu.memory_space<vmem>>, vector<64x256xbf16>
    tpu.vector_store %arg7[%c64, %c0_8], %11 {strides = array<i32>} : memref<192x256xbf16, #tpu.memory_space<vmem>>, vector<64x256xbf16>,
    %c0_9 = arith.constant 0 : index
    %c0_10 = arith.constant 0 : index
    %13 = vector.load %arg3[%c0_9, %c0_10] : memref<64x64xbf16, #tpu.memory_space<vmem>>, vector<64x64xbf16>
    %cst_11 = arith.constant dense<0.000000e+00> : vector<64x256xf32>
    %14 = tpu.matmul %13, %11, %cst_11 {dimension_numbers = #tpu.dot_dimension_numbers<[1], [0], [0], [1], [0, 0, 1, 1], [], []>} : vector<64x64xbf16>, vector<64x256xbf16>, vector<64x256xf32> -> vector<64x256xf32>
    %cst_12 = arith.constant 5.000000e-02 : f32
    %15 = vector.broadcast %cst_12 : f32 to vector<64x256xf32>
    %16 = arith.mulf %15, %2 : vector<64x256xf32>
    %cst_13 = arith.constant 0.949999988 : f32
    %17 = vector.broadcast %cst_13 : f32 to vector<64x256xf32>
    %18 = arith.mulf %17, %14 : vector<64x256xf32>
    %19 = arith.addf %16, %18 : vector<64x256xf32>
    %20 = arith.truncf %19 : vector<64x256xf32> to vector<64x256xbf16>
    %c128 = arith.constant 128 : index
    %c0_14 = arith.constant 0 : index
    %21 = vector.load %arg7[%c128, %c0_14] : memref<192x256xbf16, #tpu.memory_space<vmem>>, vector<64x256xbf16>
    tpu.vector_store %arg7[%c128, %c0_14], %20 {strides = array<i32>} : memref<192x256xbf16, #tpu.memory_space<vmem>>, vector<64x256xbf16>,
    %c0_15 = arith.constant 0 : index
    %c0_16 = arith.constant 0 : index
    %22 = vector.load %arg4[%c0_15, %c0_16] : memref<128x192xbf16, #tpu.memory_space<vmem>>, vector<128x192xbf16>
    %c0_17 = arith.constant 0 : index
    %c0_18 = arith.constant 0 : index
    %23 = vector.load %arg7[%c0_17, %c0_18] : memref<192x256xbf16, #tpu.memory_space<vmem>>, vector<192x256xbf16>
    %cst_19 = arith.constant dense<0.000000e+00> : vector<128x256xf32>
    %24 = tpu.matmul %22, %23, %cst_19 {dimension_numbers = #tpu.dot_dimension_numbers<[1], [0], [0], [1], [0, 0, 1, 1], [], []>} : vector<128x192xbf16>, vector<192x256xbf16>, vector<128x256xf32> -> vector<128x256xf32>
    %c0_20 = arith.constant 0 : index
    %c0_21 = arith.constant 0 : index
    %25 = vector.load %arg5[%c0_20, %c0_21] : memref<128x1xf32, #tpu.memory_space<vmem>>, vector<128x1xf32>
    %26 = vector.broadcast %25 : vector<128x1xf32> to vector<128x256xf32>
    %27 = arith.addf %24, %26 : vector<128x256xf32>
    %c0_22 = arith.constant 0 : index
    %c0_23 = arith.constant 0 : index
    %c0_24 = arith.constant 0 : index
    %28 = vector.load %arg6[%c0_22, %c0_23, %c0_24] : memref<1x128x256xf32, #tpu.memory_space<vmem>>, vector<1x128x256xf32>
    %29 = vector.shape_cast %28 : vector<1x128x256xf32> to vector<128x256xf32>
    %30 = vector.shape_cast %27 : vector<128x256xf32> to vector<1x128x256xf32>
    tpu.vector_store %arg6[%c0_22, %c0_23, %c0_24], %30 {strides = array<i32>} : memref<1x128x256xf32, #tpu.memory_space<vmem>>, vector<1x128x256xf32>,
    return
  }
  func.func @transform_0(%arg0: i32, %arg1: i32) -> (i32, i32, i32) {
    %c0_i32 = arith.constant 0 : i32
    %c0_i32_0 = arith.constant 0 : i32
    return %arg0, %c0_i32, %arg1 : i32, i32, i32
  }
  func.func @transform_1(%arg0: i32, %arg1: i32) -> (i32, i32) {
    %c0_i32 = arith.constant 0 : i32
    %c0_i32_0 = arith.constant 0 : i32
    %c0_i32_1 = arith.constant 0 : i32
    return %c0_i32, %c0_i32_0 : i32, i32
  }
  func.func @transform_2(%arg0: i32, %arg1: i32) -> (i32, i32) {
    %c0_i32 = arith.constant 0 : i32
    %c0_i32_0 = arith.constant 0 : i32
    %c0_i32_1 = arith.constant 0 : i32
    return %c0_i32, %c0_i32_0 : i32, i32
  }
  func.func @transform_3(%arg0: i32, %arg1: i32) -> (i32, i32) {
    %c0_i32 = arith.constant 0 : i32
    %c0_i32_0 = arith.constant 0 : i32
    %c0_i32_1 = arith.constant 0 : i32
    return %c0_i32, %c0_i32_0 : i32, i32
  }
  func.func @transform_4(%arg0: i32, %arg1: i32) -> (i32, i32, i32) {
    %c0_i32 = arith.constant 0 : i32
    %c0_i32_0 = arith.constant 0 : i32
    return %arg0, %c0_i32, %arg1 : i32, i32, i32
  }
}

</mosaic_0001>

<bundles_post_ra>
// kernel: tpu_custom_call.1
= control target key start
LH: loop header
LB: loop body
LE: loop exit
PB: predicated region body
PF: predicated region fallthrough
CT: control target
= control target key end

     0   :  { %9 = vsyncpa [#allocation5], 0  ;;  %s2396_s0 = inlined_call_operand.vmem [shape: bf16[2,64,512], index: 0, kind: input, shape index: {}]   ;;  %s2397_s1 = inlined_call_operand.vmem [shape: bf16[64,64], index: 1, kind: input, shape index: {}]   ;;  %s2398_s2 = inlined_call_operand.vmem [shape: bf16[128,192], index: 2, kind: input, shape index: {}]   ;;  %s2399_s3 = inlined_call_operand.vmem [shape: f32[128,1], index: 3, kind: input, shape index: {}]   ;;  %s2400_s4 = inlined_call_operand.hbm [shape: f32[2,128,512], index: 4, kind: output, shape index: {}]  }
   0x1   :  { %11 = vsyncpa [#allocation5 + $0x1], 0  ;;  %s1917_s15 = smov 0   ;;  %s1919_s16 = smov 0  }
   0x2   :  { %s1921_s17 = smov 0   ;;  %s1923_s18 = smov 0  }
   0x3   :  { %s1925_s19 = smov 0   ;;  %s1927_s20 = smov 0  }
   0x4   :  { %s1929_s21 = smov 0   ;;  %s1931_s22 = smov 0  }
   0x5 LB: > { %s1385_s23 = sadd.s32 4294967295, %s1886_s22   ;;  %s1386_s24 = sadd.s32 4294967294, %s1886_s22   ;;  %s1886_s22 = sphi %s1931_s22, %s17_s22   ;;  %s1882_s21 = sphi %s1929_s21, %s2410_s21   ;;  %s1878_s20 = sphi %s1927_s20, %s2409_s20   ;;  %s1874_s19 = sphi %s1925_s19, %s2408_s19   ;;  %s1870_s18 = sphi %s1923_s18, %s2407_s18   ;;  %s1866_s17 = sphi %s1921_s17, %s2406_s17   ;;  %s1862_s16 = sphi %s1919_s16, %s2405_s16   ;;  %s1858_s15 = sphi %s1917_s15, %s2404_s15  }
   0x6   : > { %s26_s25 = sadd.s32 1, %s1878_s20  ;;  %s29_s26 = sadd.s32 1, %s1882_s21 }
   0x7   : > { %p27_p0 = scmp.ge.s32.totalorder %s26_s25, 2  ;;  %p45_p1 = scmp.ne.s32.totalorder %s1866_s17, %s1862_s16 }
   0x8   : > { %p46_p2 = scmp.eq.s32.totalorder %s1886_s22, 0  ;;  %p140_p5 = scmp.eq.s32.totalorder %s1385_s23, 3 }
   0x9   : > { %s2412_s25 = smov (%p27_p0, %s26_s25), 0  ;;  %s2414_s26 = smov (!%p27_p0, %s29_s26), %s1882_s21 }
   0xa   : > { %s34_s27 = ssub.s32 %s1878_s20, %s2412_s25  ;;  %p1969_p3 = por %p46_p2, %p45_p1 }
   0xb   : > { %p31_p4 = scmp.ge.s32.totalorder %s2414_s26, 2  ;;  %p145_p6 = scmp.ne.s32.totalorder %s1862_s16, %s1858_s15 }
   0xc   : > { %p146_p7 = scmp.eq.s32.totalorder %s1386_s24, 3  ;;  %p1977_p8 = por %p140_p5, %p45_p1 }
   0xd   : > { %s2416_s26 = smov (%p31_p4, %s2414_s26), 0  ;;  %s38_s7 = sadd.s32 1, %s1866_s17 }
   0xe   : > { %p1981_p9 = por %p146_p7, %p145_p6  ;;  %s33_s5 = ssub.s32 %s1882_s21, %s2416_s26 }
   0xf   : > { %s35_s6 = sor.u32 %s34_s27, %s33_s5  ;;  %p1388_p11 = scmp.ge.s32.totalorder %s1886_s22, 4 }
  0x10   : > { %p36_p10 = scmp.eq.s32.totalorder %s35_s6, 0 }
  0x11   : > { %171 = sbr.rel (%p1388_p11) target bundleno = 37 (0x25), region = 28 }
  0x12   : > { %s1989_s8 = scalar_select %p36_p10, %s1866_s17, %s38_s7  }
  0x16   : > { %174 = sbr.rel (!%p1969_p3) target bundleno = 37 (0x25), region = 32  ;;  %s176_s9 = sand.u32 (%p1969_p3), 1, %s1866_s17  }
  0x17   : > { %s1390_s10 = sshll.u32 (%p1969_p3), %s1878_s20, 1  ;;  %s1389_s11 = sshll.u32 (%p1969_p3), %s176_s9, 6 }
  0x18   : > { %s1391_s12 = sshll.u32 (%p1969_p3), %s1882_s21, 5  ;;  %s178_s5 = scalar_lea.vmem (%p1969_p3), [#allocation3], %s1389_s11 }
  0x19   : > { %s181_s13 = sadd.s32 (%p1969_p3), %s1391_s12, %s1390_s10 }
  0x1a   : > { %s1392_s14 = sshll.u32 (%p1969_p3), %s181_s13, 2 }
  0x1b   : > { %s183_s27 = scalar_lea.vmem %s2396_s0, %s1392_s14 }
  0x1c   : > { %v226_v0 = vld [vmem:[%s183_s27] sm:$0xff]  ;;  %v228_v1 = vld [vmem:[%s183_s27 + $0x10] sm:$0xff] }
  0x1d   : > { %v230_v2 = vld [vmem:[%s183_s27 + $0x20] sm:$0xff]  ;;  %227 = vst [vmem:[%s178_s5] sm:$0xff] %v226_v0  ;;  %v232_v3 = vld [vmem:[%s183_s27 + $0x30] sm:$0xff] }
  0x1e   : > { %229 = vst [vmem:[%s178_s5 + $0x8] sm:$0xff] %v228_v1  ;;  %v234_v4 = vld [vmem:[%s183_s27 + $0x40] sm:$0xff]  ;;  %v236_v5 = vld [vmem:[%s183_s27 + $0x50] sm:$0xff] }
  0x1f   : > { %231 = vst [vmem:[%s178_s5 + $0x10] sm:$0xff] %v230_v2  ;;  %v238_v6 = vld [vmem:[%s183_s27 + $0x60] sm:$0xff]  ;;  %v240_v7 = vld [vmem:[%s183_s27 + $0x70] sm:$0xff] }
  0x20   : > { %233 = vst [vmem:[%s178_s5 + $0x18] sm:$0xff] %v232_v3 }
  0x21   : > { %235 = vst [vmem:[%s178_s5 + $0x20] sm:$0xff] %v234_v4 }
  0x22   : > { %237 = vst [vmem:[%s178_s5 + $0x28] sm:$0xff] %v236_v5 }
  0x23   : > { %239 = vst [vmem:[%s178_s5 + $0x30] sm:$0xff] %v238_v6 }
  0x24   : > { %241 = vst [vmem:[%s178_s5 + $0x38] sm:$0xff] %v240_v7 }
  0x25 PF: > { %p1393_p12 = scmp.ge.s32.totalorder %s1886_s22, 1  ;;  %p246_p13 = scmp.lt.s32.totalorder %s1886_s22, 5 }
  0x27   : > { %p247_p0 = pnand %p1393_p12, %p246_p13 }
  0x28   : > { %s2003_s28 = sand.u32 (!%p247_p0), 1, %s1862_s16   ;;  %s1653_s23 = sshll.u32 (!%p247_p0), %s1870_s18, 1 }
  0x29   : > { %250 = sbr.rel (%p247_p0) target bundleno = 750 (0x2ee), region = 70  ;;  %s1394_s6 = sshll.u32 (!%p247_p0), %s2003_s28, 6 }
  0x2a   : > { %s2006_s7 = scalar_lea.vmem (!%p247_p0), [#allocation3], %s1394_s6  ;;  %s1395_s13 = sshll.u32 (!%p247_p0), %s2003_s28, 8 }
  0x2b   : > { %s2317_s14 = scalar_lea.vmem (!%p247_p0), [#allocation4], %s1395_s13  ;;  %s1654_s24 = sshll.u32 (!%p247_p0), %s1874_s19, 6 }
  0x2c   : > { %s1294_s27 = sadd.s32 (!%p247_p0), %s1654_s24, %s1653_s23  ;;  %s1283_s10 = scalar_lea.sflag (!%p247_p0), [#allocation5], %s2003_s28 }
  0x2d   : > { %s1655_s5 = sshll.u32 (!%p247_p0), %s1294_s27, 3  ;;  %s1812_s24 = scalar_lea.hbm (!%p247_p0), %s2400_s4, 1024 }
  0x2e   : > { %v1438_v8 = vld [vmem:[%s2006_s7 + $0x30] sm:$0xf]  ;;  %v1665_v9 = vld [vmem:[%s2006_s7 + $0x34] sm:$0xf0]  ;;  %v1664_v11 = vld [vmem:[%s2006_s7 + $0x34] sm:$0xf]  ;;  %s1296_s6 = scalar_lea.hbm %s2400_s4, %s1655_s5 }
  0x2f   : > { %v1439_v10 = vor.u32 %v1665_v9, %v1438_v8  ;;  %v1440_v12 = vld [vmem:[%s2006_s7 + $0x38] sm:$0xf0]  ;;  %v1430_v13 = vld [vmem:[%s2006_s7 + $0x20] sm:$0xf]  ;;  %v1663_v15 = vld [vmem:[%s2006_s7 + $0x24] sm:$0xf0] }
  0x30   : > { %v1443_v14 = vor.u32 %v1664_v11, %v1440_v12  ;;  %v1662_v16 = vld [vmem:[%s2006_s7 + $0x24] sm:$0xf]  ;;  %v1432_v17 = vld [vmem:[%s2006_s7 + $0x28] sm:$0xf0]  ;;  %v1431_v18 = vor.u32 %v1663_v15, %v1430_v13  ;;  %v1422_v20 = vld [vmem:[%s2006_s7 + $0x10] sm:$0xf] }
  0x31   : > { %398 = vmatpush.bf16.msra.mxu0 %v1439_v10  ;;  %v1435_v19 = vor.u32 %v1662_v16, %v1432_v17  ;;  %v1661_v21 = vld [vmem:[%s2006_s7 + $0x14] sm:$0xf0]  ;;  %v1660_v22 = vld [vmem:[%s2006_s7 + $0x14] sm:$0xf]  ;;  %v1424_v23 = vld [vmem:[%s2006_s7 + $0x18] sm:$0xf0] }
  0x32   : > { %427 = vmatpush.bf16.msra.mxu1 %v1443_v14  ;;  %v1423_v24 = vor.u32 %v1661_v21, %v1422_v20  ;;  %v1427_v25 = vor.u32 %v1660_v22, %v1424_v23  ;;  %v1414_v26 = vld [vmem:[%s2006_s7] sm:$0xf]  ;;  %v1659_v27 = vld [vmem:[%s2006_s7 + $0x4] sm:$0xf0]  ;;  %v1658_v28 = vld [vmem:[%s2006_s7 + $0x4] sm:$0xf] }
  0x33   : > { %v1416_v29 = vld [vmem:[%s2006_s7 + $0x8] sm:$0xf0]  ;;  %v1415_v30 = vor.u32 %v1659_v27, %v1414_v26  ;;  %v1666_v32 = vld [vmem:[%s2397_s1] sm:$0xff]  ;;  %vm381_vm0 = vcmask 523264   ;;  %v1668_v35 = vld [vmem:[%s2397_s1 + $0x10] sm:$0xff]  ;;  %s1299_s9 = sshll.u32 %s1296_s6, 4  ;;  %s1300_s9 = int_to_ptr.hbm [resolvable:$true] %s1299_s9 }
  0x34   : > { %v1419_v31 = vor.u32 %v1658_v28, %v1416_v29  ;;  %v1667_v33 = vld [vmem:[%s2397_s1 + $0x8] sm:$0xff]  ;;  %v281_v34 = vld [vmem:[%s2006_s7] sm:$0xff]  ;;  %v1669_v36 = vld [vmem:[%s2397_s1 + $0x18] sm:$0xff]  ;;  %s1806_s11 = sshra.s32 %s1300_s9, 4  ;;  %s1807_s11 = int_to_ptr.hbm [resolvable:$true] %s1806_s11 }
  0x35   : > { %399 = vmatpush.bf16.msra.mxu0 %v1431_v18  ;;  %305 = vst [vmem:[#allocation2] sm:$0xff] %v281_v34  ;;  %v282_v37 = vld [vmem:[%s2006_s7 + $0x8] sm:$0xff]  ;;  %v283_v38 = vld [vmem:[%s2006_s7 + $0x10] sm:$0xff]  ;;  %v284_v39 = vld [vmem:[%s2006_s7 + $0x18] sm:$0xff]  ;;  %v289_v40 = vunpack.c.l.bf16 %v281_v34  ;;  %v290_v41 = vunpack.c.h.bf16 %v281_v34  ;;  %s1808_s12 = scalar_lea.hbm %s1807_s11, 256  ;;  %p1813_p4 = scmp.lt.s32.totalorder %s1807_s11, %s2400_s4 }
  0x36   : > { %428 = vmatpush.bf16.msra.mxu1 %v1435_v19  ;;  %306 = vst [vmem:[#allocation2 + $0x8] sm:$0xff] %v282_v37  ;;  %v285_v43 = vld [vmem:[%s2006_s7 + $0x20] sm:$0xff]  ;;  %v291_v50 = vunpack.c.l.bf16 %v282_v37  ;;  %v292_v52 = vunpack.c.h.bf16 %v282_v37  ;;  %v286_v57 = vld [vmem:[%s2006_s7 + $0x28] sm:$0xff]  ;;  %v293_v62 = vunpack.c.l.bf16 %v283_v38  ;;  %v294_v0 = vunpack.c.h.bf16 %v283_v38  ;;  %v287_v5 = vld [vmem:[%s2006_s7 + $0x30] sm:$0xff]  ;;  %p1809_p1 = scmp.ne.s32.totalorder %s1807_s11, %s1808_s12  ;;  %p1814_p5 = scmp.lt.s32.totalorder %s1812_s24, %s1808_s12 }
  0x37   : > { %307 = vst [vmem:[#allocation2 + $0x10] sm:$0xff] %v283_v38  ;;  %v2048_v42 = vmul.f32 0.05, %v289_v40  ;;  %v2051_v45 = vmul.f32 0.05, %v290_v41  ;;  %v295_v10 = vunpack.c.l.bf16 %v284_v39  ;;  %v296_v12 = vunpack.c.h.bf16 %v284_v39  ;;  %v288_v17 = vld [vmem:[%s2006_s7 + $0x38] sm:$0xff] }
  0x38   : > { %308 = vst [vmem:[#allocation2 + $0x18] sm:$0xff] %v284_v39  ;;  %v2057_v54 = vmul.f32 0.05, %v291_v50  ;;  %v2060_v56 = vmul.f32 0.05, %v292_v52  ;;  %v297_v22 = vunpack.c.l.bf16 %v285_v43  ;;  %s1297_s7 = sshll.u32 %s2317_s14, 4  ;;  %p1810_p2 = pnand %p1809_p1, %p1977_p8  ;;  %s1298_s7 = int_to_ptr.vmem [resolvable:$true] %s1297_s7 }
  0x39   : > { %400 = vmatpush.bf16.msra.mxu0 %v1423_v24  ;;  %309 = vst [vmem:[#allocation2 + $0x20] sm:$0xff] %v285_v43  ;;  %v2067_v2 = vmul.f32 0.05, %v293_v62  ;;  %v2070_v4 = vmul.f32 0.05, %v294_v0  ;;  %v298_v24 = vunpack.c.h.bf16 %v285_v43  ;;  %v304_v62 = vunpack.c.h.bf16 %v288_v17  ;;  %p1815_p6 = por %p1814_p5, %p1813_p4 }
  0x3a   : > { %429 = vmatpush.bf16.msra.mxu1 %v1427_v25  ;;  %310 = vst [vmem:[#allocation2 + $0x28] sm:$0xff] %v286_v57  ;;  %v2077_v14 = vmul.f32 0.05, %v295_v10  ;;  %v2080_v16 = vmul.f32 0.05, %v296_v12  ;;  %p1811_p3 = pneg %p1810_p2 }
  0x3b   : > { %311 = vst [vmem:[#allocation2 + $0x30] sm:$0xff] %v287_v5  ;;  %v2087_v26 = vmul.f32 0.05, %v297_v22  ;;  %v2090_v28 = vmul.f32 0.05, %v298_v24 }
  0x3c   : > { %312 = vst [vmem:[#allocation2 + $0x38] sm:$0xff] %v288_v17  ;;  %p1816_p7 = pnand %p1815_p6, %p1811_p3 }
  0x3d   : > { %401 = vmatpush.bf16.msra.mxu0 %v1415_v30 }
  0x3e   : > { %430 = vmatpush.bf16.msra.mxu1 %v1419_v31 }
  0x40   : > { %1444 = vmatmul.msk.bf16.vlgmr.msra.gmra.mxu0 %vm381_vm0, %v1666_v32 }
  0x41   : > { %1448 = vmatmul.msk.bf16.vlgmr.msra.gmra.mxu1 %vm381_vm0, %v1666_v32 }
  0x50   : > { %1445 = vmatmul.msk.bf16.gmra.mxu0 %vm381_vm0, %v1667_v33 }
  0x51   : > { %1449 = vmatmul.msk.bf16.gmra.mxu1 %vm381_vm0, %v1667_v33  ;;  %v299_v33 = vunpack.c.l.bf16 %v286_v57 }
  0x53   : > { %v2094_v37 = vmul.f32 0.05, %v299_v33 }
  0x60   : > { %1446 = vmatmul.msk.bf16.gmra.mxu0 %vm381_vm0, %v1668_v35 }
  0x61   : > { %1450 = vmatmul.msk.bf16.gmra.mxu1 %vm381_vm0, %v1668_v35  ;;  %v300_v35 = vunpack.c.h.bf16 %v286_v57 }
  0x63   : > { %v2096_v39 = vmul.f32 0.05, %v300_v35 }
  0x70   : > { %1447 = vmatmul.msk.bf16.gmra.mxu0 %vm381_vm0, %v1669_v36 }
  0x71   : > { %1451 = vmatmul.msk.bf16.gmra.mxu1 %vm381_vm0, %v1669_v36 }
  0xbd   : > { %v403_v44 = vpop.f32.mrf.mxu0 }
  0xbe   : > { %v468_v46 = vmul.f32 0.95, %v403_v44  ;;  %v432_v47 = vpop.f32.mrf.mxu1 }
  0xbf   : > { %v469_v48 = vmul.f32 0.95, %v432_v47 }
  0xc0   : > { %v484_v49 = vadd.f32 %v468_v46, %v2048_v42  ;;  %v301_v46 = vunpack.c.l.bf16 %v287_v5 }
  0xc1   : > { %v485_v51 = vadd.f32 %v469_v48, %v2051_v45  ;;  %v302_v48 = vunpack.c.h.bf16 %v287_v5  ;;  %v2108_v5 = vmul.f32 0.05, %v304_v62 }
  0xc2   : > { %v2100_v50 = vmul.f32 0.05, %v301_v46 }
  0xc3   : > { %v2055_v53 = vpack.c.bf16 %v485_v51, %v484_v49  ;;  %v2102_v52 = vmul.f32 0.05, %v302_v48 }
  0xc5   : > { %508 = vst [vmem:[#allocation2 + $0x40] sm:$0xff] %v2055_v53  ;;  %v405_v55 = vpop.f32.mrf.mxu0  ;;  %v553_v48 = vunpack.c.h.b16 %v2055_v53 }
  0xc6   : > { %v470_v58 = vmul.f32 0.95, %v405_v55  ;;  %v434_v59 = vpop.f32.mrf.mxu1 }
  0xc7   : > { %v471_v60 = vmul.f32 0.95, %v434_v59 }
  0xc8   : > { %v486_v61 = vadd.f32 %v470_v58, %v2057_v54 }
  0xc9   : > { %v487_v63 = vadd.f32 %v471_v60, %v2060_v56  ;;  %v303_v60 = vunpack.c.l.bf16 %v288_v17 }
  0xcb   : > { %v2065_v1 = vpack.c.bf16 %v487_v63, %v486_v61  ;;  %v2106_v0 = vmul.f32 0.05, %v303_v60 }
  0xcd   : > { %509 = vst [vmem:[#allocation2 + $0x48] sm:$0xff] %v2065_v1  ;;  %v408_v3 = vpop.f32.mrf.mxu0 }
  0xce   : > { %v472_v6 = vmul.f32 0.95, %v408_v3  ;;  %v437_v7 = vpop.f32.mrf.mxu1 }
  0xcf   : > { %v473_v8 = vmul.f32 0.95, %v437_v7 }
  0xd0   : > { %v488_v9 = vadd.f32 %v472_v6, %v2067_v2 }
  0xd1   : > { %v489_v11 = vadd.f32 %v473_v8, %v2070_v4 }
  0xd3   : > { %v2075_v13 = vpack.c.bf16 %v489_v11, %v488_v9 }
  0xd4   : > { %v1699_v62 = vld [vmem:[#allocation2 + $0x44] sm:$0xf0] }
  0xd5   : > { %510 = vst [vmem:[#allocation2 + $0x50] sm:$0xff] %v2075_v13  ;;  %v410_v15 = vpop.f32.mrf.mxu0  ;;  %v556_v35 = vunpack.c.l.b16 %v2075_v13 }
  0xd6   : > { %v474_v18 = vmul.f32 0.95, %v410_v15  ;;  %v439_v19 = vpop.f32.mrf.mxu1 }
  0xd7   : > { %v475_v20 = vmul.f32 0.95, %v439_v19 }
  0xd8   : > { %v490_v21 = vadd.f32 %v474_v18, %v2077_v14 }
  0xd9   : > { %v491_v23 = vadd.f32 %v475_v20, %v2080_v16 }
  0xdb   : > { %v2085_v25 = vpack.c.bf16 %v491_v23, %v490_v21 }
  0xdd   : > { %511 = vst [vmem:[#allocation2 + $0x58] sm:$0xff] %v2085_v25  ;;  %v413_v27 = vpop.f32.mrf.mxu0 }
  0xde   : > { %v476_v29 = vmul.f32 0.95, %v413_v27  ;;  %v442_v30 = vpop.f32.mrf.mxu1 }
  0xdf   : > { %v477_v31 = vmul.f32 0.95, %v442_v30  ;;  %v558_v30 = vunpack.c.l.b16 %v2085_v25 }
  0xe0   : > { %v492_v32 = vadd.f32 %v476_v29, %v2087_v26 }
  0xe1   : > { %v493_v34 = vadd.f32 %v477_v31, %v2090_v28  ;;  %v559_v31 = vunpack.c.h.b16 %v2085_v25 }
  0xe3   : > { %v504_v36 = vpack.c.bf16 %v493_v34, %v492_v32 }
  0xe5   : > { %512 = vst [vmem:[#allocation2 + $0x60] sm:$0xff] %v504_v36  ;;  %v415_v38 = vpop.f32.mrf.mxu0  ;;  %v560_v23 = vunpack.c.l.b16 %v504_v36  ;;  %v561_v24 = vunpack.c.h.b16 %v504_v36  ;;  %v554_v36 = vunpack.c.l.b16 %v2065_v1 }
  0xe6   : > { %v478_v40 = vmul.f32 0.95, %v415_v38  ;;  %v444_v41 = vpop.f32.mrf.mxu1  ;;  %v557_v38 = vunpack.c.h.b16 %v2075_v13 }
  0xe7   : > { %v479_v43 = vmul.f32 0.95, %v444_v41  ;;  %v570_v41 = vpack.c.b16 %v558_v30, %v556_v35  ;;  %v1560_v30 = vld [vmem:[#allocation2 + $0x28] sm:$0xf0]  ;;  %v1697_v35 = vld [vmem:[#allocation2 + $0x34] sm:$0xf0] }
  0xe8   : > { %v494_v44 = vadd.f32 %v478_v40, %v2094_v37 }
  0xe9   : > { %v495_v47 = vadd.f32 %v479_v43, %v2096_v39  ;;  %v571_v43 = vpack.c.b16 %v559_v31, %v557_v38 }
  0xeb   : > { %v505_v49 = vpack.c.bf16 %v495_v47, %v494_v44  ;;  %v555_v44 = vunpack.c.h.b16 %v2065_v1  ;;  %v552_v47 = vunpack.c.l.b16 %v2055_v53  ;;  %v1670_v1 = vld [vmem:[%s2397_s1] sm:$0xff] }
  0xec   : > { %v1590_v46 = vld [vmem:[#allocation2 + $0x60] sm:$0xf]  ;;  %v1702_v53 = vld [vmem:[#allocation2 + $0x64] sm:$0xf] }
  0xed   : > { %513 = vst [vmem:[#allocation2 + $0x68] sm:$0xff] %v505_v49  ;;  %v418_v51 = vpop.f32.mrf.mxu0  ;;  %v562_v21 = vunpack.c.l.b16 %v505_v49  ;;  %v563_v22 = vunpack.c.h.b16 %v505_v49  ;;  %v568_v13 = vpack.c.b16 %v554_v36, %v552_v47 }
  0xee   : > { %v480_v55 = vmul.f32 0.95, %v418_v51  ;;  %v447_v57 = vpop.f32.mrf.mxu1  ;;  %v1701_v51 = vld [vmem:[#allocation2 + $0x54] sm:$0xf0] }
  0xef   : > { %v481_v58 = vmul.f32 0.95, %v447_v57  ;;  %v572_v27 = vpack.c.b16 %v562_v21, %v560_v23  ;;  %v573_v29 = vpack.c.b16 %v563_v22, %v561_v24 }
  0xf0   : > { %v496_v59 = vadd.f32 %v480_v55, %v2100_v50  ;;  %v569_v55 = vpack.c.b16 %v555_v44, %v553_v48  ;;  %v1558_v44 = vld [vmem:[#allocation2 + $0x20] sm:$0xf] }
  0xf1   : > { %v497_v61 = vadd.f32 %v481_v58, %v2102_v52 }
  0xf3   : > { %v506_v63 = vpack.c.bf16 %v497_v61, %v496_v59  ;;  %v1582_v59 = vld [vmem:[#allocation2 + $0x50] sm:$0xf] }
  0xf4   : > { %v1703_v40 = vld [vmem:[#allocation2 + $0x64] sm:$0xf0]  ;;  %v1583_v60 = vor.u32 %v1701_v51, %v1582_v59  ;;  %v1592_v61 = vld [vmem:[#allocation2 + $0x68] sm:$0xf0]  ;;  %v1693_v59 = vld [vmem:[#allocation2 + $0x14] sm:$0xf0] }
  0xf5   : > { %514 = vst [vmem:[#allocation2 + $0x70] sm:$0xff] %v506_v63  ;;  %v420_v3 = vpop.f32.mrf.mxu0  ;;  %v564_v12 = vunpack.c.l.b16 %v506_v63  ;;  %v565_v18 = vunpack.c.h.b16 %v506_v63  ;;  %v1591_v25 = vor.u32 %v1703_v40, %v1590_v46  ;;  %v1595_v63 = vor.u32 %v1702_v53, %v1592_v61  ;;  %v1695_v46 = vld [vmem:[#allocation2 + $0x24] sm:$0xf0]  ;;  %v1544_v51 = vld [vmem:[#allocation2 + $0x8] sm:$0xf0] }
  0xf6   : > { %v482_v6 = vmul.f32 0.95, %v420_v3  ;;  %v449_v7 = vpop.f32.mrf.mxu1  ;;  %v1574_v3 = vld [vmem:[#allocation2 + $0x40] sm:$0xf]  ;;  %v1559_v48 = vor.u32 %v1695_v46, %v1558_v44  ;;  %v1675_v61 = vld [vmem:[%s2398_s2 + $0x4] sm:$0xf0] }
  0xf7   : > { %v483_v8 = vmul.f32 0.95, %v449_v7  ;;  %v1584_v7 = vld [vmem:[#allocation2 + $0x58] sm:$0xf0] }
  0xf8   : > { %v498_v9 = vadd.f32 %v482_v6, %v2106_v0  ;;  %v1575_v6 = vor.u32 %v1699_v62, %v1574_v3 }
  0xf9   : > { %v499_v10 = vadd.f32 %v483_v8, %v2108_v5  ;;  %v1700_v8 = vld [vmem:[#allocation2 + $0x54] sm:$0xf] }
  0xfb   : > { %v507_v11 = vpack.c.bf16 %v499_v10, %v498_v9  ;;  %v1587_v9 = vor.u32 %v1700_v8, %v1584_v7  ;;  %v1576_v10 = vld [vmem:[#allocation2 + $0x48] sm:$0xf0] }
  0xfc   : > { %v1598_v32 = vld [vmem:[#allocation2 + $0x70] sm:$0xf]  ;;  %v1704_v57 = vld [vmem:[#allocation2 + $0x74] sm:$0xf] }
  0xfd   : > { %515 = vst [vmem:[#allocation2 + $0x78] sm:$0xff] %v507_v11  ;;  %v566_v15 = vunpack.c.l.b16 %v507_v11  ;;  %v567_v17 = vunpack.c.h.b16 %v507_v11  ;;  %v1698_v11 = vld [vmem:[#allocation2 + $0x44] sm:$0xf] }
  0xff   : > { %v574_v19 = vpack.c.b16 %v566_v15, %v564_v12  ;;  %v575_v20 = vpack.c.b16 %v567_v17, %v565_v18  ;;  %v1579_v12 = vor.u32 %v1698_v11, %v1576_v10  ;;  %v1671_v15 = vld [vmem:[%s2397_s1 + $0x8] sm:$0xff]  ;;  %v1672_v18 = vld [vmem:[%s2397_s1 + $0x10] sm:$0xff]  ;;  %v1673_v17 = vld [vmem:[%s2397_s1 + $0x18] sm:$0xff] }
 0x101   : > { %600 = vmatpush.bf16.msra.mxu2 %v574_v19  ;;  %629 = vmatpush.bf16.msra.mxu3 %v575_v20  ;;  %v1696_v19 = vld [vmem:[#allocation2 + $0x34] sm:$0xf]  ;;  %v1568_v20 = vld [vmem:[#allocation2 + $0x38] sm:$0xf0] }
 0x102   : > { %v1571_v21 = vor.u32 %v1696_v19, %v1568_v20 }
 0x104   : > { %v1705_v33 = vld [vmem:[#allocation2 + $0x74] sm:$0xf0]  ;;  %v1600_v49 = vld [vmem:[#allocation2 + $0x78] sm:$0xf0] }
 0x105   : > { %601 = vmatpush.bf16.msra.mxu2 %v572_v27  ;;  %630 = vmatpush.bf16.msra.mxu3 %v573_v29  ;;  %v1599_v34 = vor.u32 %v1705_v33, %v1598_v32  ;;  %v1603_v58 = vor.u32 %v1704_v57, %v1600_v49  ;;  %v1694_v29 = vld [vmem:[#allocation2 + $0x24] sm:$0xf] }
 0x106   : > { %v1563_v33 = vor.u32 %v1694_v29, %v1560_v30 }
 0x107   : > { %1054 = vmatpush.bf16.msrb.mxu0 %v1599_v34  ;;  %v1566_v34 = vld [vmem:[#allocation2 + $0x30] sm:$0xf] }
 0x108   : > { %v1567_v38 = vor.u32 %v1697_v35, %v1566_v34 }
 0x109   : > { %602 = vmatpush.bf16.msra.mxu2 %v570_v41  ;;  %631 = vmatpush.bf16.msra.mxu3 %v571_v43  ;;  %v1692_v41 = vld [vmem:[#allocation2 + $0x14] sm:$0xf]  ;;  %v1552_v43 = vld [vmem:[#allocation2 + $0x18] sm:$0xf0] }
 0x10a   : > { %v1555_v36 = vor.u32 %v1692_v41, %v1552_v43 }
 0x10b   : > { %1055 = vmatpush.bf16.msrb.mxu0 %v1591_v25 }
 0x10d   : > { %603 = vmatpush.bf16.msra.mxu2 %v568_v13  ;;  %632 = vmatpush.bf16.msra.mxu3 %v569_v55 }
 0x10f   : > { %1056 = vmatpush.bf16.msrb.mxu0 %v1583_v60  ;;  %v1478_v60 = vld [vmem:[%s2398_s2] sm:$0xf] }
 0x110   : > { %1468 = vmatmul.msk.bf16.vlgmr.msra.gmra.mxu2 %vm381_vm0, %v1670_v1  ;;  %1472 = vmatmul.msk.bf16.vlgmr.msra.gmra.mxu3 %vm381_vm0, %v1670_v1  ;;  %v1479_v53 = vor.u32 %v1675_v61, %v1478_v60 }
 0x111   : > { %1152 = vmatpush.bf16.msrb.mxu2 %v1603_v58  ;;  %v1550_v58 = vld [vmem:[#allocation2 + $0x10] sm:$0xf] }
 0x112   : > { %v1551_v1 = vor.u32 %v1693_v59, %v1550_v58  ;;  %v742_v58 = vld [vmem:[%s2399_s3] sm:$0xff] }
 0x113   : > { %1057 = vmatpush.bf16.msrb.mxu0 %v1575_v6 }
 0x115   : > { %1153 = vmatpush.bf16.msrb.mxu2 %v1595_v63  ;;  %v1691_v63 = vld [vmem:[#allocation2 + $0x4] sm:$0xf0] }
 0x117   : > { %1058 = vmatpush.bf16.msrb.mxu0 %v1567_v38 }
 0x119   : > { %1154 = vmatpush.bf16.msrb.mxu2 %v1587_v9 }
 0x11b   : > { %1059 = vmatpush.bf16.msrb.mxu0 %v1559_v48 }
 0x11d   : > { %1155 = vmatpush.bf16.msrb.mxu2 %v1579_v12 }
 0x11f   : > { %1060 = vmatpush.bf16.msrb.mxu0 %v1551_v1 }
 0x120   : > { %1469 = vmatmul.msk.bf16.gmra.mxu2 %vm381_vm0, %v1671_v15  ;;  %1473 = vmatmul.msk.bf16.gmra.mxu3 %vm381_vm0, %v1671_v15 }
 0x121   : > { %1156 = vmatpush.bf16.msrb.mxu2 %v1571_v21  ;;  %v1486_v21 = vld [vmem:[%s2398_s2 + $0x10] sm:$0xf] }
 0x125   : > { %1157 = vmatpush.bf16.msrb.mxu2 %v1563_v33 }
 0x129   : > { %1158 = vmatpush.bf16.msrb.mxu2 %v1555_v36 }
 0x130   : > { %1470 = vmatmul.msk.bf16.gmra.mxu2 %vm381_vm0, %v1672_v18  ;;  %1474 = vmatmul.msk.bf16.gmra.mxu3 %vm381_vm0, %v1672_v18 }
 0x140   : > { %1471 = vmatmul.msk.bf16.gmra.mxu2 %vm381_vm0, %v1673_v17  ;;  %1475 = vmatmul.msk.bf16.gmra.mxu3 %vm381_vm0, %v1673_v17 }
 0x193   : > { %v605_v22 = vpop.f32.mrf.mxu2  ;;  %v634_v23 = vpop.f32.mrf.mxu3 }
 0x194   : > { %v654_v24 = vmul.f32 0.95, %v605_v22  ;;  %v655_v27 = vmul.f32 0.95, %v634_v23 }
 0x196   : > { %v670_v31 = vadd.f32 %v654_v24, %v2048_v42  ;;  %v671_v32 = vadd.f32 %v655_v27, %v2051_v45  ;;  %v1690_v45 = vld [vmem:[#allocation2 + $0x4] sm:$0xf] }
 0x197   : > { %v1547_v57 = vor.u32 %v1690_v45, %v1544_v51 }
 0x198   : > { %v686_v40 = vpack.c.bf16 %v671_v32, %v670_v31 }
 0x199   : > { %1159 = vmatpush.bf16.msrb.mxu2 %v1547_v57  ;;  %v1888_v57 = vmov 0  }
 0x19a   : > { %694 = vst [vmem:[#allocation2 + $0x80] sm:$0xff] %v686_v40  ;;  %v1494_v40 = vld [vmem:[%s2398_s2 + $0x20] sm:$0xf]  ;;  %1789 = vset.pattern.permute.xlu0 %v1888_v57  ;;  %1790 = vset.pattern.permute.xlu1 %v1888_v57 }
 0x19b   : > { %v607_v25 = vpop.f32.mrf.mxu2  ;;  %v636_v47 = vpop.f32.mrf.mxu3  ;;  %760 = vperm.xlu0 %1789, %v742_v58   ;;  %1791 = vset.pattern.permute.xlu2 %v1888_v57  ;;  %v750_v57 = vld [vmem:[%s2399_s3 + $0x40] sm:$0xff]  ;;  %v755_v58 = vld [vmem:[%s2399_s3 + $0x68] sm:$0xff] }
 0x19c   : > { %v656_v49 = vmul.f32 0.95, %v607_v25  ;;  %v657_v42 = vmul.f32 0.95, %v636_v47  ;;  %1160 = vmatmul.bf16.vlgmr.msrb.gmra.mxu2 %v1479_v53 }
 0x19e   : > { %v672_v13 = vadd.f32 %v656_v49, %v2057_v54  ;;  %v673_v55 = vadd.f32 %v657_v42, %v2060_v56  ;;  %v1542_v54 = vld [vmem:[#allocation2] sm:$0xf] }
 0x19f   : > { %v1543_v6 = vor.u32 %v1691_v63, %v1542_v54 }
 0x1a0   : > { %v687_v62 = vpack.c.bf16 %v673_v55, %v672_v13  ;;  %v1502_v13 = vld [vmem:[%s2398_s2 + $0x30] sm:$0xf] }
 0x1a1   : > { %1061 = vmatpush.bf16.msrb.mxu0 %v1543_v6 }
 0x1a2   : > { %695 = vst [vmem:[#allocation2 + $0x88] sm:$0xff] %v687_v62  ;;  %v743_v62 = vld [vmem:[%s2399_s3 + $0x8] sm:$0xff] }
 0x1a3   : > { %v610_v56 = vpop.f32.mrf.mxu2  ;;  %v639_v3 = vpop.f32.mrf.mxu3  ;;  %765 = vperm.xlu0 %1789, %v743_v62  }
 0x1a4   : > { %v658_v7 = vmul.f32 0.95, %v610_v56  ;;  %v659_v8 = vmul.f32 0.95, %v639_v3  ;;  %1062 = vmatmul.bf16.vlgmr.msrb.gmra.mxu0 %v1479_v53 }
 0x1a6   : > { %v674_v9 = vadd.f32 %v658_v7, %v2067_v2  ;;  %v675_v10 = vadd.f32 %v659_v8, %v2070_v4  ;;  %v1677_v2 = vld [vmem:[%s2398_s2 + $0x14] sm:$0xf0] }
 0x1a7   : > { %v1487_v22 = vor.u32 %v1677_v2, %v1486_v21  ;;  %v1674_v2 = vld [vmem:[%s2398_s2 + $0x4] sm:$0xf] }
 0x1a8   : > { %v688_v11 = vpack.c.bf16 %v675_v10, %v674_v9  ;;  %v1510_v9 = vld [vmem:[%s2398_s2 + $0x40] sm:$0xf]  ;;  %v1683_v10 = vld [vmem:[%s2398_s2 + $0x44] sm:$0xf0] }
 0x1a9   : > { %v1608_v21 = vld [vmem:[#allocation2 + $0x88] sm:$0xf0] }
 0x1aa   : > { %696 = vst [vmem:[#allocation2 + $0x90] sm:$0xff] %v688_v11  ;;  %v1511_v11 = vor.u32 %v1683_v10, %v1510_v9 }
 0x1ab   : > { %v612_v12 = vpop.f32.mrf.mxu2  ;;  %v641_v15 = vpop.f32.mrf.mxu3 }
 0x1ac   : > { %v660_v18 = vmul.f32 0.95, %v612_v12  ;;  %v661_v17 = vmul.f32 0.95, %v641_v15  ;;  %1165 = vmatmul.bf16.gmra.mxu2 %v1487_v22 }
 0x1ae   : > { %v676_v19 = vadd.f32 %v660_v18, %v2077_v14  ;;  %v677_v20 = vadd.f32 %v661_v17, %v2080_v16 }
 0x1b0   : > { %v689_v4 = vpack.c.bf16 %v677_v20, %v676_v19  ;;  %v744_v19 = vld [vmem:[%s2399_s3 + $0x10] sm:$0xff]  ;;  %v1707_v20 = vld [vmem:[#allocation2 + $0x84] sm:$0xf0] }
 0x1b1   : > { %v1614_v12 = vld [vmem:[#allocation2 + $0x90] sm:$0xf]  ;;  %v1708_v15 = vld [vmem:[#allocation2 + $0x94] sm:$0xf]  ;;  %770 = vperm.xlu1 %1790, %v744_v19  }
 0x1b2   : > { %697 = vst [vmem:[#allocation2 + $0x98] sm:$0xff] %v689_v4  ;;  %v1480_v4 = vld [vmem:[%s2398_s2 + $0x8] sm:$0xf0] }
 0x1b3   : > { %v615_v23 = vpop.f32.mrf.mxu2  ;;  %v644_v24 = vpop.f32.mrf.mxu3 }
 0x1b4   : > { %v662_v27 = vmul.f32 0.95, %v615_v23  ;;  %v663_v29 = vmul.f32 0.95, %v644_v24  ;;  %1067 = vmatmul.bf16.gmra.mxu0 %v1487_v22  ;;  %v1606_v22 = vld [vmem:[#allocation2 + $0x80] sm:$0xf] }
 0x1b5   : > { %v1706_v23 = vld [vmem:[#allocation2 + $0x84] sm:$0xf]  ;;  %v1607_v24 = vor.u32 %v1707_v20, %v1606_v22 }
 0x1b6   : > { %v678_v14 = vadd.f32 %v662_v27, %v2087_v26  ;;  %v679_v16 = vadd.f32 %v663_v29, %v2090_v28  ;;  %v1679_v26 = vld [vmem:[%s2398_s2 + $0x24] sm:$0xf0]  ;;  %v1611_v27 = vor.u32 %v1706_v23, %v1608_v21  ;;  %v1483_v29 = vor.u32 %v1674_v2, %v1480_v4 }
 0x1b7   : > { %v1495_v41 = vor.u32 %v1679_v26, %v1494_v40  ;;  %v1678_v26 = vld [vmem:[%s2398_s2 + $0x24] sm:$0xf] }
 0x1b8   : > { %v690_v30 = vpack.c.bf16 %v679_v16, %v678_v14  ;;  %v745_v14 = vld [vmem:[%s2399_s3 + $0x18] sm:$0xff]  ;;  %v1518_v16 = vld [vmem:[%s2398_s2 + $0x50] sm:$0xf] }
 0x1b9   : > { %v1709_v7 = vld [vmem:[#allocation2 + $0x94] sm:$0xf0]  ;;  %v1616_v8 = vld [vmem:[#allocation2 + $0x98] sm:$0xf0]  ;;  %775 = vperm.xlu1 %1790, %v745_v14  }
 0x1ba   : > { %698 = vst [vmem:[#allocation2 + $0xa0] sm:$0xff] %v690_v30  ;;  %v1615_v18 = vor.u32 %v1709_v7, %v1614_v12  ;;  %v1619_v17 = vor.u32 %v1708_v15, %v1616_v8  ;;  %v1685_v30 = vld [vmem:[%s2398_s2 + $0x54] sm:$0xf0] }
 0x1bb   : > { %v617_v31 = vpop.f32.mrf.mxu2  ;;  %v646_v32 = vpop.f32.mrf.mxu3 }
 0x1bc   : > { %v664_v33 = vmul.f32 0.95, %v617_v31  ;;  %v665_v34 = vmul.f32 0.95, %v646_v32  ;;  %1170 = vmatmul.bf16.gmra.mxu2 %v1495_v41  ;;  %v1519_v31 = vor.u32 %v1685_v30, %v1518_v16  ;;  %v1676_v32 = vld [vmem:[%s2398_s2 + $0x14] sm:$0xf] }
 0x1be   : > { %v680_v35 = vadd.f32 %v664_v33, %v2094_v37  ;;  %v681_v38 = vadd.f32 %v665_v34, %v2096_v39  ;;  %v1488_v33 = vld [vmem:[%s2398_s2 + $0x18] sm:$0xf0] }
 0x1bf   : > { %v1491_v34 = vor.u32 %v1676_v32, %v1488_v33 }
 0x1c0   : > { %v691_v28 = vpack.c.bf16 %v681_v38, %v680_v35  ;;  %v1526_v35 = vld [vmem:[%s2398_s2 + $0x60] sm:$0xf]  ;;  %v1687_v38 = vld [vmem:[%s2398_s2 + $0x64] sm:$0xf0] }
 0x1c1   : > { %v1622_v63 = vld [vmem:[#allocation2 + $0xa0] sm:$0xf]  ;;  %v1710_v56 = vld [vmem:[#allocation2 + $0xa4] sm:$0xf]  ;;  %v1527_v40 = vor.u32 %v1687_v38, %v1526_v35 }
 0x1c2   : > { %699 = vst [vmem:[#allocation2 + $0xa8] sm:$0xff] %v691_v28  ;;  %v1496_v28 = vld [vmem:[%s2398_s2 + $0x28] sm:$0xf0] }
 0x1c3   : > { %v620_v43 = vpop.f32.mrf.mxu2  ;;  %v649_v36 = vpop.f32.mrf.mxu3 }
 0x1c4   : > { %v666_v44 = vmul.f32 0.95, %v620_v43  ;;  %v667_v46 = vmul.f32 0.95, %v649_v36  ;;  %1072 = vmatmul.bf16.gmra.mxu0 %v1495_v41  ;;  %v1499_v41 = vor.u32 %v1678_v26, %v1496_v28  ;;  %v746_v43 = vld [vmem:[%s2399_s3 + $0x20] sm:$0xff]  ;;  %v749_v36 = vld [vmem:[%s2399_s3 + $0x38] sm:$0xff] }
 0x1c5   : > { %780 = vperm.xlu2 %1791, %v746_v43   ;;  %795 = vperm.xlu1 %1790, %v749_v36  }
 0x1c6   : > { %v682_v37 = vadd.f32 %v666_v44, %v2100_v50  ;;  %v683_v39 = vadd.f32 %v667_v46, %v2102_v52  ;;  %v1681_v50 = vld [vmem:[%s2398_s2 + $0x34] sm:$0xf0]  ;;  %v748_v44 = vld [vmem:[%s2399_s3 + $0x30] sm:$0xff] }
 0x1c7   : > { %v1503_v55 = vor.u32 %v1681_v50, %v1502_v13  ;;  %790 = vperm.xlu0 %1789, %v748_v44   ;;  %v1534_v46 = vld [vmem:[%s2398_s2 + $0x70] sm:$0xf]  ;;  %v1512_v13 = vld [vmem:[%s2398_s2 + $0x48] sm:$0xf0] }
 0x1c8   : > { %v692_v25 = vpack.c.bf16 %v683_v39, %v682_v37  ;;  %v1689_v37 = vld [vmem:[%s2398_s2 + $0x74] sm:$0xf0] }
 0x1c9   : > { %v1711_v53 = vld [vmem:[#allocation2 + $0xa4] sm:$0xf0]  ;;  %v1624_v54 = vld [vmem:[#allocation2 + $0xa8] sm:$0xf0]  ;;  %v1535_v39 = vor.u32 %v1689_v37, %v1534_v46 }
 0x1ca   : > { %700 = vst [vmem:[#allocation2 + $0xb0] sm:$0xff] %v692_v25  ;;  %v1623_v3 = vor.u32 %v1711_v53, %v1622_v63  ;;  %v1627_v6 = vor.u32 %v1710_v56, %v1624_v54  ;;  %v747_v25 = vld [vmem:[%s2399_s3 + $0x28] sm:$0xff]  ;;  %v756_v54 = vld [vmem:[%s2399_s3 + $0x70] sm:$0xff] }
 0x1cb   : > { %v622_v47 = vpop.f32.mrf.mxu2  ;;  %v651_v48 = vpop.f32.mrf.mxu3 }
 0x1cc   : > { %v668_v49 = vmul.f32 0.95, %v622_v47  ;;  %v669_v42 = vmul.f32 0.95, %v651_v48  ;;  %1175 = vmatmul.bf16.gmra.mxu2 %v1503_v55  ;;  %v1680_v47 = vld [vmem:[%s2398_s2 + $0x34] sm:$0xf] }
 0x1cd   : > { %v1504_v48 = vld [vmem:[%s2398_s2 + $0x38] sm:$0xf0]  ;;  %785 = vperm.xlu2 %1791, %v747_v25  }
 0x1ce   : > { %v684_v45 = vadd.f32 %v668_v49, %v2106_v0  ;;  %v685_v51 = vadd.f32 %v669_v42, %v2108_v5  ;;  %v1507_v49 = vor.u32 %v1680_v47, %v1504_v48  ;;  %v751_v42 = vld [vmem:[%s2399_s3 + $0x48] sm:$0xff] }
 0x1cf   : > { %805 = vperm.xlu0 %1789, %v751_v42  }
 0x1d0   : > { %v693_v52 = vpack.c.bf16 %v685_v51, %v684_v45  ;;  %v754_v45 = vld [vmem:[%s2399_s3 + $0x60] sm:$0xff] }
 0x1d1   : > { %v1630_v0 = vld [vmem:[#allocation2 + $0xb0] sm:$0xf]  ;;  %v1712_v59 = vld [vmem:[#allocation2 + $0xb4] sm:$0xf]  ;;  %v1682_v51 = vld [vmem:[%s2398_s2 + $0x44] sm:$0xf] }
 0x1d2   : > { %701 = vst [vmem:[#allocation2 + $0xb8] sm:$0xff] %v693_v52  ;;  %v1515_v50 = vor.u32 %v1682_v51, %v1512_v13  ;;  %v752_v52 = vld [vmem:[%s2399_s3 + $0x50] sm:$0xff] }
 0x1d3   : > { %810 = vperm.xlu1 %1790, %v752_v52  }
 0x1d4   : > { %1077 = vmatmul.bf16.gmra.mxu0 %v1503_v55  ;;  %v757_v55 = vld [vmem:[%s2399_s3 + $0x78] sm:$0xff] }
 0x1d5   : > { %800 = vperm.xlu2 %1791, %v750_v57  }
 0x1d7   : > { %820 = vperm.xlu0 %1789, %v754_v45  }
 0x1d9   : > { %v1713_v5 = vld [vmem:[#allocation2 + $0xb4] sm:$0xf0]  ;;  %v1632_v1 = vld [vmem:[#allocation2 + $0xb8] sm:$0xf0] }
 0x1da   : > { %v1631_v60 = vor.u32 %v1713_v5, %v1630_v0  ;;  %v1635_v61 = vor.u32 %v1712_v59, %v1632_v1  ;;  %v1684_v0 = vld [vmem:[%s2398_s2 + $0x54] sm:$0xf]  ;;  %v1520_v5 = vld [vmem:[%s2398_s2 + $0x58] sm:$0xf0] }
 0x1db   : > { %825 = vperm.xlu1 %1790, %v755_v58   ;;  %v1523_v59 = vor.u32 %v1684_v0, %v1520_v5  ;;  %v753_v1 = vld [vmem:[%s2399_s3 + $0x58] sm:$0xff] }
 0x1dc   : > { %1107 = vmatpush.bf16.msrb.mxu1 %v1631_v60  ;;  %1205 = vmatpush.bf16.msrb.mxu3 %v1635_v61  ;;  %v1686_v60 = vld [vmem:[%s2398_s2 + $0x64] sm:$0xf]  ;;  %v1528_v61 = vld [vmem:[%s2398_s2 + $0x68] sm:$0xf0] }
 0x1dd   : > { %1180 = vmatmul.bf16.gmra.mxu2 %v1511_v11  ;;  %815 = vperm.xlu2 %1791, %v753_v1   ;;  %v1531_v53 = vor.u32 %v1686_v60, %v1528_v61 }
 0x1df   : > { %835 = vperm.xlu0 %1789, %v757_v55  }
 0x1e0   : > { %1108 = vmatpush.bf16.msrb.mxu1 %v1623_v3  ;;  %1206 = vmatpush.bf16.msrb.mxu3 %v1627_v6  ;;  %v1688_v3 = vld [vmem:[%s2398_s2 + $0x74] sm:$0xf]  ;;  %v1536_v6 = vld [vmem:[%s2398_s2 + $0x78] sm:$0xf0] }
 0x1e1   : > { %v1539_v8 = vor.u32 %v1688_v3, %v1536_v6 }
 0x1e4   : > { %1109 = vmatpush.bf16.msrb.mxu1 %v1615_v18  ;;  %1207 = vmatpush.bf16.msrb.mxu3 %v1619_v17 }
 0x1e5   : > { %1082 = vmatmul.bf16.gmra.mxu0 %v1511_v11  ;;  %830 = vperm.xlu2 %1791, %v756_v54  }
 0x1e8   : > { %1110 = vmatpush.bf16.msrb.mxu1 %v1607_v24  ;;  %1208 = vmatpush.bf16.msrb.mxu3 %v1611_v27 }
 0x1eb   : > { %1644 = vmatmul.msk.bf16.vlgmr.msrb.gmra.mxu3 %vm381_vm0, %v1483_v29  ;;  %1636 = vmatmul.msk.bf16.vlgmr.msrb.gmra.mxu1 %vm381_vm0, %v1483_v29 }
 0x1ed   : > { %1185 = vmatmul.bf16.gmra.mxu2 %v1519_v31 }
 0x1f5   : > { %1087 = vmatmul.bf16.gmra.mxu0 %v1519_v31 }
 0x1fb   : > { %1645 = vmatmul.msk.bf16.gmra.mxu3 %vm381_vm0, %v1491_v34  ;;  %1637 = vmatmul.msk.bf16.gmra.mxu1 %vm381_vm0, %v1491_v34 }
 0x1fd   : > { %1190 = vmatmul.bf16.gmra.mxu2 %v1527_v40 }
 0x205   : > { %1092 = vmatmul.bf16.gmra.mxu0 %v1527_v40 }
 0x20b   : > { %1646 = vmatmul.msk.bf16.gmra.mxu3 %vm381_vm0, %v1499_v41  ;;  %1638 = vmatmul.msk.bf16.gmra.mxu1 %vm381_vm0, %v1499_v41 }
 0x20d   : > { %1195 = vmatmul.bf16.gmra.mxu2 %v1535_v39  ;;  %v761_v11 = vpop.permute.xlu0 %760 }
 0x215   : > { %1097 = vmatmul.bf16.gmra.mxu0 %v1535_v39  ;;  %v766_v21 = vpop.permute.xlu0 %765 }
 0x21b   : > { %1647 = vmatmul.msk.bf16.gmra.mxu3 %vm381_vm0, %v1507_v49  ;;  %1639 = vmatmul.msk.bf16.gmra.mxu1 %vm381_vm0, %v1507_v49 }
 0x21f   : > { %v1161_v63 = vpop.f32.mrf.mxu2  ;;  %v781_v37 = vpop.permute.xlu2 %780 }
 0x220   : > { %v1162_v20 = vadd.f32 %v1161_v63, %v761_v11 }
 0x221   : > { %v1063_v62 = vpop.f32.mrf.mxu0 }
 0x222   : > { %v1064_v15 = vadd.f32 %v1063_v62, %v761_v11 }
 0x223   : > { %v771_v29 = vpop.permute.xlu1 %770 }
 0x227   : > { %v1163_v7 = vpop.f32.mrf.mxu2 }
 0x228   : > { %v1164_v16 = vadd.f32 %v1163_v7, %v766_v21 }
 0x229   : > { %v1065_v56 = vpop.f32.mrf.mxu0 }
 0x22a   : > { %v1066_v23 = vadd.f32 %v1065_v56, %v766_v21 }
 0x22b   : > { %1648 = vmatmul.msk.bf16.gmra.mxu3 %vm381_vm0, %v1515_v50  ;;  %1640 = vmatmul.msk.bf16.gmra.mxu1 %vm381_vm0, %v1515_v50  ;;  %v776_v40 = vpop.permute.xlu1 %775  ;;  %v786_v50 = vpop.permute.xlu2 %785 }
 0x22f   : > { %v1166_v10 = vpop.f32.mrf.mxu2 }
 0x230   : > { %v1167_v38 = vadd.f32 %v1166_v10, %v771_v29 }
 0x231   : > { %v1068_v9 = vpop.f32.mrf.mxu0 }
 0x232   : > { %v1069_v30 = vadd.f32 %v1068_v9, %v771_v29 }
 0x237   : > { %v1168_v19 = vpop.f32.mrf.mxu2  ;;  %v796_v6 = vpop.permute.xlu1 %795 }
 0x238   : > { %v1169_v39 = vadd.f32 %v1168_v19, %v776_v40 }
 0x239   : > { %v1070_v12 = vpop.f32.mrf.mxu0 }
 0x23a   : > { %v1071_v43 = vadd.f32 %v1070_v12, %v776_v40 }
 0x23b   : > { %1649 = vmatmul.msk.bf16.gmra.mxu3 %vm381_vm0, %v1523_v59  ;;  %1641 = vmatmul.msk.bf16.gmra.mxu1 %vm381_vm0, %v1523_v59  ;;  %v791_v59 = vpop.permute.xlu0 %790 }
 0x23f   : > { %v1171_v14 = vpop.f32.mrf.mxu2 }
 0x240   : > { %v1172_v51 = vadd.f32 %v1171_v14, %v781_v37 }
 0x241   : > { %v1073_v4 = vpop.f32.mrf.mxu0 }
 0x242   : > { %v1074_v25 = vadd.f32 %v1073_v4, %v781_v37 }
 0x247   : > { %v1173_v28 = vpop.f32.mrf.mxu2 }
 0x248   : > { %v1174_v1 = vadd.f32 %v1173_v28, %v786_v50 }
 0x249   : > { %v1075_v34 = vpop.f32.mrf.mxu0 }
 0x24a   : > { %v1076_v57 = vadd.f32 %v1075_v34, %v786_v50 }
 0x24b   : > { %1650 = vmatmul.msk.bf16.gmra.mxu3 %vm381_vm0, %v1531_v53  ;;  %1642 = vmatmul.msk.bf16.gmra.mxu1 %vm381_vm0, %v1531_v53 }
 0x24f   : > { %v1176_v42 = vpop.f32.mrf.mxu2 }
 0x250   : > { %v1177_v56 = vadd.f32 %v1176_v42, %v791_v59 }
 0x251   : > { %v1078_v46 = vpop.f32.mrf.mxu0 }
 0x252   : > { %v1079_v60 = vadd.f32 %v1078_v46, %v791_v59 }
 0x257   : > { %v1178_v5 = vpop.f32.mrf.mxu2 }
 0x259   : > { %v1080_v13 = vpop.f32.mrf.mxu0 }
 0x25b   : > { %1651 = vmatmul.msk.bf16.gmra.mxu3 %vm381_vm0, %v1539_v8  ;;  %1643 = vmatmul.msk.bf16.gmra.mxu1 %vm381_vm0, %v1539_v8  ;;  %v1081_v8 = vadd.f32 %v1080_v13, %v796_v6 }
 0x260   : > { %v1181_v3 = vpop.f32.mrf.mxu2 }
 0x262   : > { %v1083_v62 = vpop.f32.mrf.mxu0 }
 0x268   : > { %v1112_v18 = vpop.f32.mrf.mxu1 }
 0x269   : > { %v1113_v17 = vadd.f32 %v1112_v18, %v1064_v15  ;;  %v801_v15 = vpop.permute.xlu2 %800  ;;  %v1179_v18 = vadd.f32 %v1178_v5, %v796_v6 }
 0x26a   : > { %v1085_v11 = vpop.f32.mrf.mxu0 }
 0x26b   : > { %1250 = vst [vmem:[%s2317_s14] sm:$0xff] %v1113_v17  ;;  %v1084_v17 = vadd.f32 %v1083_v62, %v801_v15 }
 0x26e   : > { %v1210_v2 = vpop.f32.mrf.mxu3 }
 0x26f   : > { %v1211_v22 = vadd.f32 %v1210_v2, %v1162_v20  ;;  %v1183_v20 = vpop.f32.mrf.mxu2 }
 0x270   : > { %v1114_v24 = vpop.f32.mrf.mxu1 }
 0x271   : > { %1251 = vst [vmem:[%s2317_s14 + $0x8] sm:$0xff] %v1211_v22  ;;  %v1115_v27 = vadd.f32 %v1114_v24, %v1066_v23  ;;  %v1182_v23 = vadd.f32 %v1181_v3, %v801_v15  ;;  %v806_v24 = vpop.permute.xlu0 %805 }
 0x272   : > { %v1088_v22 = vpop.f32.mrf.mxu0  ;;  %v1086_v14 = vadd.f32 %v1085_v11, %v806_v24  ;;  %v1184_v34 = vadd.f32 %v1183_v20, %v806_v24 }
 0x273   : > { %1252 = vst [vmem:[%s2317_s14 + $0x10] sm:$0xff] %v1115_v27 }
 0x276   : > { %v1212_v31 = vpop.f32.mrf.mxu3 }
 0x277   : > { %v1213_v32 = vadd.f32 %v1212_v31, %v1164_v16 }
 0x278   : > { %v1117_v33 = vpop.f32.mrf.mxu1 }
 0x279   : > { %1253 = vst [vmem:[%s2317_s14 + $0x18] sm:$0xff] %v1213_v32  ;;  %v1118_v35 = vadd.f32 %v1117_v33, %v1069_v30  ;;  %v1186_v30 = vpop.f32.mrf.mxu2  ;;  %v811_v32 = vpop.permute.xlu1 %810 }
 0x27a   : > { %v1090_v33 = vpop.f32.mrf.mxu0 }
 0x27b   : > { %1254 = vst [vmem:[%s2317_s14 + $0x20] sm:$0xff] %v1118_v35  ;;  %v1089_v35 = vadd.f32 %v1088_v22, %v811_v32 }
 0x27e   : > { %v1215_v26 = vpop.f32.mrf.mxu3 }
 0x27f   : > { %v1216_v41 = vadd.f32 %v1215_v26, %v1167_v38 }
 0x280   : > { %v1119_v36 = vpop.f32.mrf.mxu1 }
 0x281   : > { %1255 = vst [vmem:[%s2317_s14 + $0x28] sm:$0xff] %v1216_v41  ;;  %v1120_v44 = vadd.f32 %v1119_v36, %v1071_v43  ;;  %v1188_v41 = vpop.f32.mrf.mxu2  ;;  %v1187_v43 = vadd.f32 %v1186_v30, %v811_v32  ;;  %v816_v36 = vpop.permute.xlu2 %815 }
 0x282   : > { %v1093_v46 = vpop.f32.mrf.mxu0  ;;  %v1091_v37 = vadd.f32 %v1090_v33, %v816_v36 }
 0x283   : > { %1256 = vst [vmem:[%s2317_s14 + $0x30] sm:$0xff] %v1120_v44 }
 0x286   : > { %v1217_v47 = vpop.f32.mrf.mxu3 }
 0x287   : > { %v1218_v48 = vadd.f32 %v1217_v47, %v1169_v39 }
 0x288   : > { %v1122_v49 = vpop.f32.mrf.mxu1 }
 0x289   : > { %1257 = vst [vmem:[%s2317_s14 + $0x38] sm:$0xff] %v1218_v48  ;;  %v1123_v45 = vadd.f32 %v1122_v49, %v1074_v25  ;;  %v1191_v48 = vpop.f32.mrf.mxu2  ;;  %v1189_v49 = vadd.f32 %v1188_v41, %v816_v36 }
 0x28b   : > { %1258 = vst [vmem:[%s2317_s14 + $0x40] sm:$0xff] %v1123_v45  ;;  %v821_v45 = vpop.permute.xlu0 %820 }
 0x28e   : > { %v1220_v52 = vpop.f32.mrf.mxu3 }
 0x28f   : > { %v1221_v55 = vadd.f32 %v1220_v52, %v1172_v51  ;;  %v1094_v51 = vadd.f32 %v1093_v46, %v821_v45  ;;  %v1095_v52 = vpop.f32.mrf.mxu0 }
 0x290   : > { %v1124_v58 = vpop.f32.mrf.mxu1 }
 0x291   : > { %1259 = vst [vmem:[%s2317_s14 + $0x48] sm:$0xff] %v1221_v55  ;;  %v1125_v0 = vadd.f32 %v1124_v58, %v1076_v57  ;;  %v826_v57 = vpop.permute.xlu1 %825  ;;  %v1192_v58 = vadd.f32 %v1191_v48, %v821_v45  ;;  %v1193_v5 = vpop.f32.mrf.mxu2 }
 0x293   : > { %1260 = vst [vmem:[%s2317_s14 + $0x50] sm:$0xff] %v1125_v0 }
 0x296   : > { %v1222_v61 = vpop.f32.mrf.mxu3 }
 0x297   : > { %v1223_v53 = vadd.f32 %v1222_v61, %v1174_v1  ;;  %v1096_v1 = vadd.f32 %v1095_v52, %v826_v57  ;;  %v1098_v62 = vpop.f32.mrf.mxu0 }
 0x298   : > { %v1127_v54 = vpop.f32.mrf.mxu1 }
 0x299   : > { %1261 = vst [vmem:[%s2317_s14 + $0x58] sm:$0xff] %v1223_v53  ;;  %v1128_v63 = vadd.f32 %v1127_v54, %v1079_v60  ;;  %v831_v53 = vpop.permute.xlu2 %830  ;;  %v1194_v54 = vadd.f32 %v1193_v5, %v826_v57  ;;  %v1196_v6 = vpop.f32.mrf.mxu2 }
 0x29a   : > { %v1197_v11 = vadd.f32 %v1196_v6, %v831_v53 }
 0x29b   : > { %1262 = vst [vmem:[%s2317_s14 + $0x60] sm:$0xff] %v1128_v63 }
 0x29e   : > { %v1225_v7 = vpop.f32.mrf.mxu3 }
 0x29f   : > { %v1226_v9 = vadd.f32 %v1225_v7, %v1177_v56  ;;  %v1099_v56 = vadd.f32 %v1098_v62, %v831_v53 }
 0x2a0   : > { %v1129_v10 = vpop.f32.mrf.mxu1 }
 0x2a1   : > { %v1130_v12 = vadd.f32 %v1129_v10, %v1081_v8  ;;  %1263 = vst [vmem:[%s2317_s14 + $0x68] sm:$0xff] %v1226_v9  ;;  %v836_v9 = vpop.permute.xlu0 %835  ;;  %v1100_v10 = vpop.f32.mrf.mxu0 }
 0x2a2   : > { %v1101_v15 = vadd.f32 %v1100_v10, %v836_v9  ;;  %v1198_v20 = vpop.f32.mrf.mxu2 }
 0x2a3   : > { %1264 = vst [vmem:[%s2317_s14 + $0x70] sm:$0xff] %v1130_v12 }
 0x2a6   : > { %v1227_v19 = vpop.f32.mrf.mxu3 }
 0x2a7   : > { %v1228_v21 = vadd.f32 %v1227_v19, %v1179_v18 }
 0x2a8   : > { %v1132_v2 = vpop.f32.mrf.mxu1 }
 0x2a9   : > { %1265 = vst [vmem:[%s2317_s14 + $0x78] sm:$0xff] %v1228_v21  ;;  %v1133_v4 = vadd.f32 %v1132_v2, %v1084_v17  ;;  %v1199_v21 = vadd.f32 %v1198_v20, %v836_v9 }
 0x2ab   : > { %1266 = vst [vmem:[%s2317_s14 + $0x80] sm:$0xff] %v1133_v4 }
 0x2ae   : > { %v1230_v27 = vpop.f32.mrf.mxu3 }
 0x2af   : > { %v1231_v29 = vadd.f32 %v1230_v27, %v1182_v23 }
 0x2b0   : > { %v1134_v16 = vpop.f32.mrf.mxu1 }
 0x2b1   : > { %1267 = vst [vmem:[%s2317_s14 + $0x88] sm:$0xff] %v1231_v29  ;;  %v1135_v31 = vadd.f32 %v1134_v16, %v1086_v14 }
 0x2b3   : > { %1268 = vst [vmem:[%s2317_s14 + $0x90] sm:$0xff] %v1135_v31 }
 0x2b6   : > { %v1232_v38 = vpop.f32.mrf.mxu3 }
 0x2b7   : > { %v1233_v40 = vadd.f32 %v1232_v38, %v1184_v34 }
 0x2b8   : > { %v1137_v26 = vpop.f32.mrf.mxu1 }
 0x2b9   : > { %1269 = vst [vmem:[%s2317_s14 + $0x98] sm:$0xff] %v1233_v40  ;;  %v1138_v28 = vadd.f32 %v1137_v26, %v1089_v35 }
 0x2bb   : > { %1270 = vst [vmem:[%s2317_s14 + $0xa0] sm:$0xff] %v1138_v28 }
 0x2be   : > { %v1235_v44 = vpop.f32.mrf.mxu3 }
 0x2bf   : > { %v1236_v39 = vadd.f32 %v1235_v44, %v1187_v43 }
 0x2c0   : > { %v1139_v25 = vpop.f32.mrf.mxu1 }
 0x2c1   : > { %v1140_v47 = vadd.f32 %v1139_v25, %v1091_v37  ;;  %1271 = vst [vmem:[%s2317_s14 + $0xa8] sm:$0xff] %v1236_v39 }
 0x2c3   : > { %1272 = vst [vmem:[%s2317_s14 + $0xb0] sm:$0xff] %v1140_v47 }
 0x2c6   : > { %v1237_v42 = vpop.f32.mrf.mxu3 }
 0x2c7   : > { %v1238_v13 = vadd.f32 %v1237_v42, %v1189_v49 }
 0x2c8   : > { %v1142_v50 = vpop.f32.mrf.mxu1 }
 0x2c9   : > { %v1143_v55 = vadd.f32 %v1142_v50, %v1094_v51  ;;  %1273 = vst [vmem:[%s2317_s14 + $0xb8] sm:$0xff] %v1238_v13 }
 0x2cb   : > { %1274 = vst [vmem:[%s2317_s14 + $0xc0] sm:$0xff] %v1143_v55 }
 0x2ce   : > { %v1240_v0 = vpop.f32.mrf.mxu3 }
 0x2cf   : > { %v1241_v59 = vadd.f32 %v1240_v0, %v1192_v58 }
 0x2d0   : > { %v1144_v60 = vpop.f32.mrf.mxu1 }
 0x2d1   : > { %1275 = vst [vmem:[%s2317_s14 + $0xc8] sm:$0xff] %v1241_v59  ;;  %v1145_v61 = vadd.f32 %v1144_v60, %v1096_v1 }
 0x2d3   : > { %1276 = vst [vmem:[%s2317_s14 + $0xd0] sm:$0xff] %v1145_v61 }
 0x2d6   : > { %v1242_v63 = vpop.f32.mrf.mxu3 }
 0x2d7   : > { %v1243_v3 = vadd.f32 %v1242_v63, %v1194_v54 }
 0x2d8   : > { %v1147_v7 = vpop.f32.mrf.mxu1 }
 0x2d9   : > { %v1148_v8 = vadd.f32 %v1147_v7, %v1099_v56  ;;  %1277 = vst [vmem:[%s2317_s14 + $0xd8] sm:$0xff] %v1243_v3 }
 0x2db   : > { %1278 = vst [vmem:[%s2317_s14 + $0xe0] sm:$0xff] %v1148_v8 }
 0x2de   : > { %v1245_v12 = vpop.f32.mrf.mxu3 }
 0x2df   : > { %v1246_v18 = vadd.f32 %v1245_v12, %v1197_v11 }
 0x2e0   : > { %v1149_v17 = vpop.f32.mrf.mxu1 }
 0x2e1   : > { %v1150_v19 = vadd.f32 %v1149_v17, %v1101_v15  ;;  %1279 = vst [vmem:[%s2317_s14 + $0xe8] sm:$0xff] %v1246_v18 }
 0x2e3   : > { %1280 = vst [vmem:[%s2317_s14 + $0xf0] sm:$0xff] %v1150_v19 }
 0x2e6   : > { %v1247_v2 = vpop.f32.mrf.mxu3 }
 0x2e7   : > { %v1248_v4 = vadd.f32 %v1247_v2, %v1199_v21 }
 0x2e9   : > { %1281 = vst [vmem:[%s2317_s14 + $0xf8] sm:$0xff] %v1248_v4 }
 0x2ea   : > { %1819 = shalt.err (!%p1816_p7)
}
 0x2eb   : > { %s1889_s28 = smov 256   ;;  %s1890_s14 = smov 512  }
 0x2ec   : > { %s1891_s18 = smov 16  }
 0x2ed   : > { %1714 = dma.vmem_to_hbm [thread:$0]  (%p1977_p8), %s1298_s7, 4096, %s1300_s9, %s1283_s10, %s1889_s28, %s1890_s14, %s1891_s18  }
 0x2ee PF: > { %p1720_p10 = scmp.ge.s32.totalorder %s1886_s22, 2  ;;  %s1314_s19 = sand.u32 1, %s1858_s15  }
 0x2ef   : > { %s1315_s6 = scalar_lea.sflag [#allocation5], %s1314_s19 }
 0x2f0   : > { %p1717_p11 = pnand %p1720_p10, %p1981_p9 }
 0x2f2   : > { %p1718_p12 = pneg %p1717_p11 }
 0x2f4   : > { %1853 = dma.done.wait (%p1718_p12), %s1315_s6, 4096  }
 0x2f5   : > { %1855 = vsyncadd (%p1718_p12), %s1315_s6, 4294963200  ;;  %s17_s22 = sadd.s32 1, %s1886_s22   ;;  %s2404_s15 = smov %s1862_s16 }
 0x2f6   : > { %p14_p13 = scmp.ge.s32.totalorder %s17_s22, 6   ;;  %s2405_s16 = smov %s1866_s17 }
 0x2f7   : > { %s2406_s17 = smov %s1989_s8  ;;  %s2407_s18 = smov %s1878_s20 }
 0x2f8   : > { %s2408_s19 = smov %s1882_s21  ;;  %s2409_s20 = smov %s2412_s25 }
 0x2f9   : > { %s2410_s21 = smov %s2416_s26  ;;  %16 = sbr.rel (!%p14_p13) target bundleno = 5 (0x5), region = 114 }
 0x2fe   :  { %1321 = vsyncpa [#allocation5], 1 }
 0x2ff   :  { %1323 = vsyncpa [#allocation5 + $0x1], 1 }

</bundles_post_ra>
